<compile_context>
chip_gen: v5e
topology: v5e:2x2
jax: 0.10.0
libtpu: 0.0.40
codegen_flags: <defaults>
</compile_context>

<pallas_src>
import jax
import jax.numpy as jnp
from jax import lax
from jax.experimental import pallas as pl
from jax.experimental.pallas import tpu as pltpu


def _round_up(x: int, m: int) -> int:
    return ((x + m - 1) // m) * m


def _pick_tile(rows: int, budget_rows: int, num_cores: int, sublane: int) -> int:
    """Largest useful row tile: min(per-core row chunk, VMEM budget share)."""
    per_core = _round_up(max(pl.cdiv(rows, num_cores), 1), sublane)
    budget = max((budget_rows // sublane) * sublane, sublane)
    tm = min(per_core, budget)
    # A tile >= the array dim must equal the array dim (full-dim blocks are
    # always legal regardless of the (8,128) divisibility rule).
    return rows if tm >= rows else tm


def _make_kernel(b1, b2, tm1, tm2, t1, t2, t1_pc, t2_pc):
    def tile_rowsum(f_ref, tm, nrows, tile_idx):
        # Normalization math in f32 (v5e has no bf16 VPU/EUP path).
        f = f_ref[...].astype(jnp.float32)                       # (tm, D)
        ss = jnp.sum(f * f, axis=1, keepdims=True)               # (tm, 1)
        inv = lax.rsqrt(ss)                                      # EUP slot
        # Mask rows past the real row count (partial last tile).
        row = tile_idx * tm + lax.broadcasted_iota(jnp.int32, (tm, 1), 0)
        nf = jnp.where(row < nrows, f * inv, 0.0)                # (tm, D)
        return jnp.sum(nf, axis=0, keepdims=True)                # (1, D)

    def kernel(f1_ref, f2_ref, s1_ref, s2_ref):
        c = pl.program_id(0)   # core ("parallel") axis
        i = pl.program_id(1)   # sequential reduction axis

        @pl.when(i == 0)
        def _init():
            s1_ref[...] = jnp.zeros_like(s1_ref)
            s2_ref[...] = jnp.zeros_like(s2_ref)

        # Skip all compute on clamped / out-of-range tiles (the DMA is already
        # skipped by Pallas because the block index does not change).
        tile1 = c * t1_pc + i

        @pl.when(jnp.logical_and(i < t1_pc, tile1 < t1))
        def _acc1():
            s1_ref[...] += tile_rowsum(f1_ref, tm1, b1, tile1).reshape(s1_ref.shape)

        tile2 = c * t2_pc + i

        @pl.when(jnp.logical_and(i < t2_pc, tile2 < t2))
        def _acc2():
            s2_ref[...] += tile_rowsum(f2_ref, tm2, b2, tile2).reshape(s2_ref.shape)

    return kernel


def eachother_dot(fea1: jax.Array, fea2: jax.Array, *,
                  num_cores: int = 2,
                  input_vmem_budget_bytes: int = 16 << 20) -> jax.Array:
    """Pallas equivalent of eachother_dot.forward. Returns a scalar (f32)."""
    assert fea1.ndim == 2 and fea2.ndim == 2
    assert fea1.shape[1] == fea2.shape[1]

    b1, d = fea1.shape
    b2, _ = fea2.shape

    it1 = jnp.dtype(fea1.dtype).itemsize
    it2 = jnp.dtype(fea2.dtype).itemsize
    sub1 = 16 if it1 == 2 else 8   # sublane packing: 16 rows/vreg for 16-bit
    sub2 = 16 if it2 == 2 else 8

    # Split the input-streaming VMEM budget proportionally to B1:B2 so that
    # t1 ~= t2 per core and both DMA streams stay live the whole kernel.
    row_bytes1 = d * it1 * 2       # x2 pipeline buffers
    row_bytes2 = d * it2 * 2
    budget1 = max(int(input_vmem_budget_bytes * (b1 / (b1 + b2))), row_bytes1)
    budget2 = max(input_vmem_budget_bytes - budget1, row_bytes2)
    tm1 = _pick_tile(b1, budget1 // row_bytes1, num_cores, sub1)
    tm2 = _pick_tile(b2, budget2 // row_bytes2, num_cores, sub2)

    t1 = pl.cdiv(b1, tm1)
    t2 = pl.cdiv(b2, tm2)
    t1_pc = pl.cdiv(t1, num_cores)   # tiles per core
    t2_pc = pl.cdiv(t2, num_cores)
    grid_t = max(t1_pc, t2_pc)

    # Index maps clamp to each input's last valid tile; clamped / repeated
    # tiles contribute nothing (pl.when skip inside the kernel).
    def f1_map(c, i):
        return (jnp.minimum(c * t1_pc + i, t1 - 1), 0)

    def f2_map(c, i):
        return (jnp.minimum(c * t2_pc + i, t2 - 1), 0)

    kernel = _make_kernel(b1, b2, tm1, tm2, t1, t2, t1_pc, t2_pc)

    # Actual input-buffer VMEM plus headroom; keep safely under v7x's 64 MiB
    # physical VMEM while raising the v5e 16 MiB scoped default if needed.
    in_bytes = 2 * (tm1 * d * it1 + tm2 * d * it2)
    vmem_limit = int(min(max(2 * in_bytes + (8 << 20), 32 << 20), 56 << 20))

    s1, s2 = pl.pallas_call(
        kernel,
        out_shape=(
            jax.ShapeDtypeStruct((num_cores, 1, d), jnp.float32),
            jax.ShapeDtypeStruct((num_cores, 1, d), jnp.float32),
        ),
        grid_spec=pltpu.PrefetchScalarGridSpec(
            num_scalar_prefetch=0,
            grid=(num_cores, grid_t),
            in_specs=[
                pl.BlockSpec((tm1, d), f1_map),
                pl.BlockSpec((tm2, d), f2_map),
            ],
            out_specs=[
                pl.BlockSpec((1, 1, d), lambda c, i: (c, 0, 0)),
                pl.BlockSpec((1, 1, d), lambda c, i: (c, 0, 0)),
            ],
        ),
        compiler_params=pltpu.CompilerParams(
            # Leading axis sharded across TensorCores on v7x (2 TCs); on
            # v5e/v6e (1 TC) it runs sequentially at negligible extra cost.
            dimension_semantics=("parallel", "arbitrary"),
            vmem_limit_bytes=vmem_limit,
        ),
    )(fea1, fea2)

    # O(D) combine in the wrapper: sum per-core partial row-sums, one dot,
    # single 1/(B1*B2) scale.
    s1 = jnp.sum(s1[:, 0, :], axis=0)
    s2 = jnp.sum(s2[:, 0, :], axis=0)
    return jnp.sum(s1 * s2) / (b1 * b2)


def _reference(fea1, fea2):
    nf1 = fea1.astype(jnp.float32)
    nf2 = fea2.astype(jnp.float32)
    nf1 = nf1 / jnp.linalg.norm(nf1, axis=1, keepdims=True)
    nf2 = nf2 / jnp.linalg.norm(nf2, axis=1, keepdims=True)
    return jnp.mean(nf1 @ nf2.T)


if __name__ == "__main__":
    key = jax.random.PRNGKey(0)
    k1, k2, k3, k4 = jax.random.split(key, 4)

    # Case 1: small, unequal row counts, non-multiple-of-tile rows.
    B1, B2, D = 20, 12, 128
    fea1 = jax.random.normal(k1, (B1, D), dtype=jnp.float32)
    fea2 = jax.random.normal(k2, (B2, D), dtype=jnp.float32)
    dis = jax.block_until_ready(eachother_dot(fea1, fea2))
    ref = _reference(fea1, fea2)
    assert jnp.allclose(dis, ref, atol=1e-5, rtol=1e-5), (dis, ref)

    # Case 2: tiny VMEM budget to force multi-tile grid steps, clamped tiles
    # on the shorter input, and the per-core tile partition.
    B1b, B2b, Db = 200, 40, 128
    fea1b = jax.random.normal(k3, (B1b, Db), dtype=jnp.float32)
    fea2b = jax.random.normal(k4, (B2b, Db), dtype=jnp.float32)
    tiny_budget = 48 * Db * 4 * 2   # ~48 rows total per pipeline-buffer pair
    dis_b = jax.block_until_ready(
        eachother_dot(fea1b, fea2b, input_vmem_budget_bytes=tiny_budget))
    ref_b = _reference(fea1b, fea2b)
    assert jnp.allclose(dis_b, ref_b, atol=1e-5, rtol=1e-5), (dis_b, ref_b)

    print("KERNEL_OK")
</pallas_src>

<mosaic_0001>
module attributes {stable_mosaic.version = 11 : i64} {
  func.func @kernel(%arg0: i32, %arg1: i32, %arg2: memref<16x128xf32, #tpu.memory_space<vmem>>, %arg3: memref<8x128xf32, #tpu.memory_space<vmem>>, %arg4: memref<1x1x128xf32, #tpu.memory_space<vmem>>, %arg5: memref<1x1x128xf32, #tpu.memory_space<vmem>>) attributes {dimension_semantics = [#tpu.dimension_semantics<parallel>, #tpu.dimension_semantics<arbitrary>], iteration_bounds = array<i64: 2, 1>, scalar_prefetch = 0 : i64, scratch_operands = 0 : i64, tpu.core_type = #tpu.core_type<tc>, window_params = [{transform_indices = @transform_0, window_bounds = array<i64: 16, 128>}, {transform_indices = @transform_1, window_bounds = array<i64: 8, 128>}, {transform_indices = @transform_2, window_bounds = array<i64: 1, 1, 128>}, {transform_indices = @transform_3, window_bounds = array<i64: 1, 1, 128>}]} {
    %c0_i32 = arith.constant 0 : i32
    %0 = arith.cmpi eq, %arg1, %c0_i32 : i32
    %1 = arith.extui %0 : i1 to i32
    %c0_i32_0 = arith.constant 0 : i32
    %2 = arith.cmpi ne, %1, %c0_i32_0 : i32
    scf.if %2 {
      %cst = arith.constant 0.000000e+00 : f32
      %17 = vector.broadcast %cst : f32 to vector<1x1x128xf32>
      %c0 = arith.constant 0 : index
      %c0_7 = arith.constant 0 : index
      %c0_8 = arith.constant 0 : index
      %18 = vector.load %arg4[%c0, %c0_7, %c0_8] : memref<1x1x128xf32, #tpu.memory_space<vmem>>, vector<1x1x128xf32>
      tpu.vector_store %arg4[%c0, %c0_7, %c0_8], %17 {strides = array<i32>} : memref<1x1x128xf32, #tpu.memory_space<vmem>>, vector<1x1x128xf32>,
      %cst_9 = arith.constant 0.000000e+00 : f32
      %19 = vector.broadcast %cst_9 : f32 to vector<1x1x128xf32>
      %c0_10 = arith.constant 0 : index
      %c0_11 = arith.constant 0 : index
      %c0_12 = arith.constant 0 : index
      %20 = vector.load %arg5[%c0_10, %c0_11, %c0_12] : memref<1x1x128xf32, #tpu.memory_space<vmem>>, vector<1x1x128xf32>
      tpu.vector_store %arg5[%c0_10, %c0_11, %c0_12], %19 {strides = array<i32>} : memref<1x1x128xf32, #tpu.memory_space<vmem>>, vector<1x1x128xf32>,
    } else {
    }
    %c1_i32 = arith.constant 1 : i32
    %3 = arith.muli %arg0, %c1_i32 : i32
    %4 = arith.addi %3, %arg1 : i32
    %c1_i32_1 = arith.constant 1 : i32
    %5 = arith.cmpi slt, %arg1, %c1_i32_1 : i32
    %c2_i32 = arith.constant 2 : i32
    %6 = arith.cmpi slt, %4, %c2_i32 : i32
    %7 = arith.andi %5, %6 : i1
    %8 = arith.extui %7 : i1 to i32
    %c0_i32_2 = arith.constant 0 : i32
    %9 = arith.cmpi ne, %8, %c0_i32_2 : i32
    scf.if %9 {
      %c0 = arith.constant 0 : index
      %c0_7 = arith.constant 0 : index
      %c0_8 = arith.constant 0 : index
      %17 = vector.load %arg4[%c0, %c0_7, %c0_8] : memref<1x1x128xf32, #tpu.memory_space<vmem>>, vector<1x1x128xf32>
      %c0_9 = arith.constant 0 : index
      %c0_10 = arith.constant 0 : index
      %18 = vector.load %arg2[%c0_9, %c0_10] : memref<16x128xf32, #tpu.memory_space<vmem>>, vector<16x128xf32>
      %19 = arith.mulf %18, %18 : vector<16x128xf32>
      %cst = arith.constant dense<0.000000e+00> : vector<16xf32>
      %20 = vector.multi_reduction <add>, %19, %cst [1] : vector<16x128xf32> to vector<16xf32>
      %21 = vector.shape_cast %20 : vector<16xf32> to vector<16x1xf32>
      %22 = math.rsqrt %21 : vector<16x1xf32>
      %c16_i32 = arith.constant 16 : i32
      %23 = arith.muli %4, %c16_i32 : i32
      %24 = tpu.iota {dimensions = array<i32: 0>} : vector<16x1xi32>
      %25 = vector.broadcast %23 : i32 to vector<16x1xi32>
      %26 = arith.addi %25, %24 : vector<16x1xi32>
      %c20_i32 = arith.constant 20 : i32
      %27 = vector.broadcast %c20_i32 : i32 to vector<16x1xi32>
      %28 = arith.cmpi slt, %26, %27 : vector<16x1xi32>
      %29 = vector.broadcast %22 : vector<16x1xf32> to vector<16x128xf32>
      %30 = arith.mulf %18, %29 : vector<16x128xf32>
      %cst_11 = arith.constant 0.000000e+00 : f32
      %31 = vector.shape_cast %28 : vector<16x1xi1> to vector<16x1xi1>
      %32 = vector.broadcast %31 : vector<16x1xi1> to vector<16x128xi1>
      %33 = vector.broadcast %cst_11 : f32 to vector<16x128xf32>
      %34 = arith.select %32, %30, %33 : vector<16x128xi1>, vector<16x128xf32>
      %cst_12 = arith.constant dense<0.000000e+00> : vector<128xf32>
      %35 = vector.multi_reduction <add>, %34, %cst_12 [0] : vector<16x128xf32> to vector<128xf32>
      %36 = vector.shape_cast %35 : vector<128xf32> to vector<1x128xf32>
      %37 = vector.shape_cast %36 : vector<1x128xf32> to vector<1x1x128xf32>
      %38 = arith.addf %17, %37 : vector<1x1x128xf32>
      %c0_13 = arith.constant 0 : index
      %c0_14 = arith.constant 0 : index
      %c0_15 = arith.constant 0 : index
      %39 = vector.load %arg4[%c0_13, %c0_14, %c0_15] : memref<1x1x128xf32, #tpu.memory_space<vmem>>, vector<1x1x128xf32>
      tpu.vector_store %arg4[%c0_13, %c0_14, %c0_15], %38 {strides = array<i32>} : memref<1x1x128xf32, #tpu.memory_space<vmem>>, vector<1x1x128xf32>,
    } else {
    }
    %c1_i32_3 = arith.constant 1 : i32
    %10 = arith.muli %arg0, %c1_i32_3 : i32
    %11 = arith.addi %10, %arg1 : i32
    %c1_i32_4 = arith.constant 1 : i32
    %12 = arith.cmpi slt, %arg1, %c1_i32_4 : i32
    %c2_i32_5 = arith.constant 2 : i32
    %13 = arith.cmpi slt, %11, %c2_i32_5 : i32
    %14 = arith.andi %12, %13 : i1
    %15 = arith.extui %14 : i1 to i32
    %c0_i32_6 = arith.constant 0 : i32
    %16 = arith.cmpi ne, %15, %c0_i32_6 : i32
    scf.if %16 {
      %c0 = arith.constant 0 : index
      %c0_7 = arith.constant 0 : index
      %c0_8 = arith.constant 0 : index
      %17 = vector.load %arg5[%c0, %c0_7, %c0_8] : memref<1x1x128xf32, #tpu.memory_space<vmem>>, vector<1x1x128xf32>
      %c0_9 = arith.constant 0 : index
      %c0_10 = arith.constant 0 : index
      %18 = vector.load %arg3[%c0_9, %c0_10] : memref<8x128xf32, #tpu.memory_space<vmem>>, vector<8x128xf32>
      %19 = arith.mulf %18, %18 : vector<8x128xf32>
      %cst = arith.constant dense<0.000000e+00> : vector<8xf32>
      %20 = vector.multi_reduction <add>, %19, %cst [1] : vector<8x128xf32> to vector<8xf32>
      %21 = vector.shape_cast %20 : vector<8xf32> to vector<8x1xf32>
      %22 = math.rsqrt %21 : vector<8x1xf32>
      %c8_i32 = arith.constant 8 : i32
      %23 = arith.muli %11, %c8_i32 : i32
      %24 = tpu.iota {dimensions = array<i32: 0>} : vector<8x1xi32>
      %25 = vector.broadcast %23 : i32 to vector<8x1xi32>
      %26 = arith.addi %25, %24 : vector<8x1xi32>
      %c12_i32 = arith.constant 12 : i32
      %27 = vector.broadcast %c12_i32 : i32 to vector<8x1xi32>
      %28 = arith.cmpi slt, %26, %27 : vector<8x1xi32>
      %29 = vector.broadcast %22 : vector<8x1xf32> to vector<8x128xf32>
      %30 = arith.mulf %18, %29 : vector<8x128xf32>
      %cst_11 = arith.constant 0.000000e+00 : f32
      %31 = vector.shape_cast %28 : vector<8x1xi1> to vector<8x1xi1>
      %32 = vector.broadcast %31 : vector<8x1xi1> to vector<8x128xi1>
      %33 = vector.broadcast %cst_11 : f32 to vector<8x128xf32>
      %34 = arith.select %32, %30, %33 : vector<8x128xi1>, vector<8x128xf32>
      %cst_12 = arith.constant dense<0.000000e+00> : vector<128xf32>
      %35 = vector.multi_reduction <add>, %34, %cst_12 [0] : vector<8x128xf32> to vector<128xf32>
      %36 = vector.shape_cast %35 : vector<128xf32> to vector<1x128xf32>
      %37 = vector.shape_cast %36 : vector<1x128xf32> to vector<1x1x128xf32>
      %38 = arith.addf %17, %37 : vector<1x1x128xf32>
      %c0_13 = arith.constant 0 : index
      %c0_14 = arith.constant 0 : index
      %c0_15 = arith.constant 0 : index
      %39 = vector.load %arg5[%c0_13, %c0_14, %c0_15] : memref<1x1x128xf32, #tpu.memory_space<vmem>>, vector<1x1x128xf32>
      tpu.vector_store %arg5[%c0_13, %c0_14, %c0_15], %38 {strides = array<i32>} : memref<1x1x128xf32, #tpu.memory_space<vmem>>, vector<1x1x128xf32>,
    } else {
    }
    return
  }
  func.func @transform_0(%arg0: i32, %arg1: i32) -> (i32, i32) {
    %c1_i32 = arith.constant 1 : i32
    %0 = arith.muli %arg0, %c1_i32 : i32
    %1 = arith.addi %0, %arg1 : i32
    %c1_i32_0 = arith.constant 1 : i32
    %2 = arith.minsi %1, %c1_i32_0 : i32
    %c0_i32 = arith.constant 0 : i32
    %c0_i32_1 = arith.constant 0 : i32
    return %2, %c0_i32 : i32, i32
  }
  func.func @transform_1(%arg0: i32, %arg1: i32) -> (i32, i32) {
    %c1_i32 = arith.constant 1 : i32
    %0 = arith.muli %arg0, %c1_i32 : i32
    %1 = arith.addi %0, %arg1 : i32
    %c1_i32_0 = arith.constant 1 : i32
    %2 = arith.minsi %1, %c1_i32_0 : i32
    %c0_i32 = arith.constant 0 : i32
    %c0_i32_1 = arith.constant 0 : i32
    return %2, %c0_i32 : i32, i32
  }
  func.func @transform_2(%arg0: i32, %arg1: i32) -> (i32, i32, i32) {
    %c0_i32 = arith.constant 0 : i32
    %c0_i32_0 = arith.constant 0 : i32
    %c0_i32_1 = arith.constant 0 : i32
    return %arg0, %c0_i32, %c0_i32_0 : i32, i32, i32
  }
  func.func @transform_3(%arg0: i32, %arg1: i32) -> (i32, i32, i32) {
    %c0_i32 = arith.constant 0 : i32
    %c0_i32_0 = arith.constant 0 : i32
    %c0_i32_1 = arith.constant 0 : i32
    return %arg0, %c0_i32, %c0_i32_0 : i32, i32, i32
  }
}

</mosaic_0001>

<bundles_post_ra>
// kernel: tpu_custom_call.1
= control target key start
LH: loop header
LB: loop body
LE: loop exit
PB: predicated region body
PF: predicated region fallthrough
CT: control target
= control target key end

     0   :  { %s1131_s0 = inlined_call_operand.hbm [shape: f32[20,128], index: 0, kind: input, shape index: {}]   ;;  %s1132_s1 = inlined_call_operand.hbm [shape: f32[12,128], index: 1, kind: input, shape index: {}]   ;;  %s1133_s2 = inlined_call_operand.hbm [shape: f32[2,1,128], index: 2, kind: output, shape index: {0}]   ;;  %s1134_s3 = inlined_call_operand.hbm [shape: f32[2,1,128], index: 3, kind: output, shape index: {1}]  }
   0x1   :  { %1139 = sst [smem:[#allocation19_spill]] %s1131_s0 }
   0x2   :  { %9 = vsyncpa [#allocation3], 0 }
   0x3   :  { %11 = vsyncpa [#allocation3 + $0x1], 0 }
   0x4   :  { %12 = vsyncpa [#allocation6], 0 }
   0x5   :  { %14 = vsyncpa [#allocation6 + $0x1], 0 }
   0x6   :  { %15 = vsyncpa [#allocation4], 0 }
   0x7   :  { %17 = vsyncpa [#allocation4 + $0x1], 0 }
   0x8   :  { %18 = vsyncpa [#allocation9], 0 }
   0x9   :  { %20 = vsyncpa [#allocation9 + $0x1], 0  ;;  %s895_s12 = smov 0   ;;  %s897_s13 = smov 0  }
   0xa   :  { %s899_s14 = smov 0   ;;  %s901_s15 = smov 0  }
   0xb   :  { %s903_s16 = smov 0   ;;  %s905_s17 = smov 0  }
   0xc   :  { %s907_s18 = smov 0   ;;  %s909_s19 = smov 0  }
   0xd   :  { %s911_s20 = smov 0  }
   0xe LB: > { %1140 = sst [smem:[#allocation14_spill]] %s845_s14  ;;  %s541_s21 = sadd.s32 4294967295, %s869_s20   ;;  %s869_s20 = sphi %s911_s20, %s26_s20   ;;  %s865_s19 = sphi %s909_s19, %s1156_s19   ;;  %s861_s18 = sphi %s907_s18, %s1155_s18   ;;  %s857_s17 = sphi %s905_s17, %s1161_s17   ;;  %s853_s16 = sphi %s903_s16, %s1160_s16   ;;  %s849_s15 = sphi %s901_s15, %s1159_s15   ;;  %s845_s14 = sphi %s899_s14, %s1153_s14   ;;  %s841_s13 = sphi %s897_s13, %s1158_s13   ;;  %s837_s12 = sphi %s895_s12, %s1157_s12  }
   0xf   : > { %1141 = sst [smem:[#allocation15_spill]] %s865_s19  ;;  %s542_s22 = sadd.s32 4294967294, %s869_s20  }
  0x10   : > { %s38_s23 = sadd.s32 1, %s865_s19  ;;  %p43_p0 = scmp.lt.s32.totalorder %s865_s19, 1 }
  0x11   : > { %p40_p1 = scmp.ge.s32.totalorder %s38_s23, 2  ;;  %s51_s24 = sadd.s32 1, %s857_s17 }
  0x12   : > { %s944_s25 = scalar_select %p43_p0, %s865_s19, 1 }
  0x13   : > { %s1163_s23 = smov (%p40_p1, %s38_s23), 0  ;;  %p58_p2 = scmp.ne.s32.totalorder %s857_s17, %s853_s16 }
  0x14   : > { %1142 = sst [smem:[#allocation16_spill]] %s1163_s23  ;;  %p59_p3 = scmp.eq.s32.totalorder %s869_s20, 0 }
  0x15   : > { %p46_p4 = scmp.lt.s32.totalorder %s1163_s23, 1  ;;  %p64_p5 = scmp.ne.s32.totalorder %s853_s16, %s849_s15 }
  0x16   : > { %p953_p6 = por %p59_p3, %p58_p2  ;;  %p65_p7 = scmp.eq.s32.totalorder %s541_s21, 0 }
  0x17   : > { %s47_s27 = scalar_select %p46_p4, %s1163_s23, 1 }
  0x18   : > { %p958_p8 = por %p65_p7, %p64_p5  ;;  %s106_s29 = ssub.s32 %s865_s19, %s1163_s23 }
  0x19   : > { %s48_s30 = ssub.s32 %s944_s25, %s47_s27  ;;  %p107_p9 = scmp.eq.s32.totalorder %s106_s29, 0 }
  0x1a   : > { %p49_p10 = scmp.eq.s32.totalorder %s48_s30, 0  ;;  %s109_s4 = sadd.s32 1, %s845_s14 }
  0x1b   : > { %s967_s5 = scalar_select %p107_p9, %s845_s14, %s109_s4  }
  0x1c   : > { %s970_s6 = scalar_select %p49_p10, %s857_s17, %s51_s24  }
  0x1d   : > { %1145 = sst [smem:[#allocation17_spill]] %s967_s5  ;;  %p119_p11 = scmp.ne.s32.totalorder %s845_s14, %s841_s13 }
  0x1e   : > { %1146 = sst [smem:[#allocation18_spill]] %s970_s6  ;;  %p120_p12 = scmp.eq.s32.totalorder %s541_s21, 1 }
  0x1f   : > { %p125_p13 = scmp.ne.s32.totalorder %s841_s13, %s837_s12  ;;  %p126_p0 = scmp.eq.s32.totalorder %s542_s22, 1 }
  0x20   : > { %p976_p1 = por %p120_p12, %p119_p11  ;;  %p544_p3 = scmp.ge.s32.totalorder %s869_s20, 2 }
  0x21   : > { %p980_p2 = por %p126_p0, %p125_p13 }
  0x22   : > { %168 = sbr.rel (%p544_p3) target bundleno = 87 (0x57), region = 16 }
  0x27   : > { %171 = sbr.rel (!%p953_p6) target bundleno = 82 (0x52), region = 20  ;;  %s172_s9 = sand.u32 (%p953_p6), 1, %s857_s17  }
  0x28   : > { %s546_s10 = sshll.u32 (%p953_p6), %s944_s25, 1  ;;  %s545_s11 = sshll.u32 (%p953_p6), %s172_s9, 4 }
  0x29   : > { %s181_s15 = ssub.s32 (%p953_p6), 3, %s546_s10  ;;  %s994_s27 = scalar_lea.sflag (%p953_p6), [#allocation3], %s172_s9 }
  0x2a   : > { %p182_p4 = scmp.lt.s32.totalorder (%p953_p6), %s181_s15, 2  ;;  %s176_s29 = scalar_lea.vmem (%p953_p6), [#allocation2], %s545_s11 }
  0x2c   : > { %s1165_s15 = smov (!%p182_p4, %s181_s15), 2 }
  0x2d   : > { %s547_s21 = sshll.u32 %s1165_s15, 3 }
  0x2e   : > { %s185_s22 = ssub.s32 16, %s547_s21 }
  0x2f   : > { %s186_s24 = sshll.u32 %s185_s22, 4 }
  0x30   : > { %187 = vsyncadd %s994_s27, %s186_s24  ;;  %p997_p5 = scmp.ne.s32.totalorder %s547_s21, 0  ;;  %s562_s4 = sshll.u32 %s944_s25, 4 }
  0x31   : > { %s1150_s0 = sld [smem:[#allocation19_spill]]  ;;  %s1005_s6 = sshll.u32 %s176_s29, 4  ;;  %s195_s6 = int_to_ptr.vmem [resolvable:$true] %s1005_s6 }
  0x32   : > { %s1137_s11 = sshll.u32 %s1165_s15, 7 }
  0x33   : > { %s662_s21 = sshrl.u32 %s1137_s11, 4 }
  0x37   : > { %s190_s19 = scalar_lea.hbm %s1150_s0, %s562_s4  ;;  %s671_s29 = scalar_lea.hbm %s1150_s0, 24 }
  0x38   : > { %s192_s9 = sshll.u32 %s190_s19, 4  ;;  %s1008_s9 = int_to_ptr.hbm [resolvable:$true] %s192_s9 }
  0x39   : > { %s660_s22 = sshra.s32 %s1008_s9, 4  ;;  %s661_s22 = int_to_ptr.hbm [resolvable:$true] %s660_s22 }
  0x3a   : > { %s667_s24 = scalar_lea.hbm %s661_s22, %s662_s21 }
  0x3b   : > { %p668_p7 = scmp.ne.s32.totalorder %s661_s22, %s667_s24  ;;  %p673_p11 = scmp.lt.s32.totalorder %s671_s29, %s667_s24 }
  0x3d   : > { %p669_p9 = pnand %p668_p7, %p997_p5 }
  0x3f   : > { %p670_p10 = pneg %p669_p9 }
  0x41   : > { %p675_p12 = pnand %p673_p11, %p670_p10 }
  0x43   : > { %678 = shalt.err (!%p675_p12)
}
  0x44   : > { %s679_s19 = sshra.s32 %s195_s6, 4  ;;  %s871_s22 = smov [#allocation2]   ;;  %s680_s19 = int_to_ptr.vmem [resolvable:$true] %s679_s19 }
  0x45   : > { %s686_s10 = scalar_lea.vmem %s680_s19, %s662_s21  ;;  %s690_s11 = scalar_lea.vmem %s871_s22, 32 }
  0x46   : > { %p687_p13 = scmp.ne.s32.totalorder %s680_s19, %s686_s10  ;;  %p692_p7 = scmp.lt.s32.totalorder %s690_s11, %s686_s10 }
  0x48   : > { %p688_p0 = pnand %p687_p13, %p997_p5 }
  0x4a   : > { %p689_p4 = pneg %p688_p0 }
  0x4c   : > { %p694_p9 = pnand %p692_p7, %p689_p4 }
  0x4e   : > { %697 = shalt.err (!%p694_p9)
}
  0x4f   : > { %s872_s23 = smov 128   ;;  %s873_s24 = smov 8  }
  0x50   : > { %s1151_s4 = sshll.u32 %s1165_s15, 7 }
  0x51   : > { %200 = dma.hbm_to_vmem [thread:$0]  (%p997_p5), %s1008_s9, %s1151_s4, %s195_s6, %s994_s27, %s872_s23, %s872_s23, %s873_s24  }
  0x52 PF: > { %s204_s21 = sand.u32 1, %s857_s17   ;;  %s553_s29 = sshll.u32 %s944_s25, 3 }
  0x53   : > { %s552_s11 = sshll.u32 %s204_s21, 3  ;;  %s215_s22 = scalar_lea.hbm %s1132_s1, %s553_s29 }
  0x54   : > { %s217_s0 = sshll.u32 %s215_s22, 4  ;;  %s208_s5 = scalar_lea.vmem [#allocation5], %s552_s11  ;;  %s218_s0 = int_to_ptr.hbm [resolvable:$true] %s217_s0 }
  0x55   : > { %s219_s14 = sshll.u32 %s208_s5, 4  ;;  %s205_s30 = scalar_lea.sflag [#allocation6], %s204_s21  ;;  %s220_s14 = int_to_ptr.vmem [resolvable:$true] %s219_s14 }
  0x56   : > { %564 = dma.hbm_to_vmem [thread:$0]  (%p953_p6), %s218_s0, 128, %s220_s14, %s205_s30  }
  0x57 PF: > { %p554_p5 = scmp.ge.s32.totalorder %s869_s20, 1  ;;  %p224_p10 = scmp.lt.s32.totalorder %s869_s20, 3 }
  0x59   : > { %p225_p11 = pnand %p554_p5, %p224_p10 }
  0x5a   : > { %s230_s25 = sand.u32 (!%p225_p11), 1, %s853_s16  }
  0x5b   : > { %228 = sbr.rel (%p225_p11) target bundleno = 295 (0x127), region = 28  ;;  %s555_s6 = sshll.u32 (!%p225_p11), %s230_s25, 4 }
  0x5c   : > { %s231_s15 = scalar_lea.sflag (!%p225_p11), [#allocation3], %s230_s25  ;;  %s234_s27 = scalar_lea.vmem (!%p225_p11), [#allocation2], %s555_s6 }
  0x60   : > { %820 = dma.done.wait (%p958_p8), %s231_s15, 256  }
  0x61   : > { %822 = vsyncadd (%p958_p8), %s231_s15, 4294967040  ;;  %s556_s0 = sshll.u32 %s230_s25, 3  ;;  %s241_s14 = scalar_lea.sflag [#allocation6], %s230_s25 }
  0x62   : > { %s244_s26 = scalar_lea.vmem [#allocation5], %s556_s0 }
  0x63   : > { %824 = dma.done.wait (%p958_p8), %s241_s14, 128  }
  0x64   : > { %826 = vsyncadd (%p958_p8), %s241_s14, 4294967168  ;;  %s1050_s5 = sand.u32 1, %s841_s13   ;;  %p295_p6 = scmp.lt.s32.totalorder %s861_s18, 2  ;;  %v874_v0 = vmov 0.0  }
  0x65   : > { %s1054_s9 = scalar_lea.vmem [#allocation7], %s1050_s5  ;;  %s1058_s23 = scalar_lea.vmem [#allocation8], %s1050_s5  ;;  %v356_v1 = vld [vmem:[%s244_s26] sm:$0xff] (%p295_p6)  ;;  %v302_v5 = vld [vmem:[%s234_s27 + $0x8] sm:$0xff] (%p295_p6)  ;;  %v330_v9 = vlaneseq (%p295_p6) }
  0x66   : > { %291 = vst [vmem:[%s1054_s9] sm:$0x1] %v874_v0  ;;  %299 = sbr.rel (!%p295_p6) target bundleno = 267 (0x10b), region = 44  ;;  %v301_v2 = vld [vmem:[%s234_s27] sm:$0xff] (%p295_p6)  ;;  %v357_v3 = vmul.f32 (%p295_p6), %v356_v1, %v356_v1  ;;  %v304_v6 = vmul.f32 (%p295_p6), %v302_v5, %v302_v5  ;;  %s559_s28 = sshll.u32 (%p295_p6), %s861_s18, 3 }
  0x67   : > { %292 = vst [vmem:[%s1058_s23] sm:$0x1] %v874_v0  ;;  %v303_v4 = vmul.f32 (%p295_p6), %v301_v2, %v301_v2  ;;  %v331_v14 = vshrl.u32 (%p295_p6), %v330_v9, 7  ;;  %v371_v16 = vstv (%p295_p6), %s559_s28  ;;  %s558_s24 = sshll.u32 (%p295_p6), %s861_s18, 4 }
  0x68   : > { %358 = vadd.xlane.f32.xlu1 (%p295_p6), %v357_v3  ;;  %v333_v27 = vstv (%p295_p6), %s558_s24 }
  0x69   : > { %305 = vadd.xlane.f32.xlu0 (%p295_p6), %v303_v4  ;;  %v372_v20 = vadd.s32 (%p295_p6), %v371_v16, %v331_v14  ;;  %v332_v28 = vadd.s32 (%p295_p6), 8, %v331_v14  ;;  %v334_v35 = vadd.s32 (%p295_p6), %v333_v27, %v331_v14 }
  0x6b   : > { %vm373_vm3 = vcmp.lt.s32.totalorder %v372_v20, 12  ;;  %v335_v36 = vadd.s32 %v333_v27, %v332_v28  ;;  %vm336_vm10 = vcmp.lt.s32.totalorder %v334_v35, 20 }
  0x6d   : > { %vm337_vm11 = vcmp.lt.s32.totalorder %v335_v36, 20  ;;  %v300_v59 = vld [vmem:[%s1054_s9] sm:$0x1] }
  0x6e   : > { %v355_v51 = vld [vmem:[%s1058_s23] sm:$0x1] }
  0x71   : > { %307 = vadd.xlane.f32.xlu0 %v304_v6 }
  0xdb   : > { %v359_v7 = vpop.xlane.xlu1 %358 }
  0xdc   : > { %v306_v8 = vpop.xlane.xlu0 %305  ;;  %654 = vrsqrt.f32 %v359_v7  ;;  %vm366_vm0 = vweird.f32 %v359_v7 }
  0xdd   : > { %656 = vrsqrt.f32 %v306_v8  ;;  %vm315_vm5 = vweird.f32 %v306_v8 }
  0xe2   : > { %v655_v10 = vpop.eup %654 }
  0xe3   : > { %v657_v11 = vpop.eup %656  ;;  %v361_v12 = vmul.f32 %v655_v10, %v359_v7  ;;  %vm367_vm1 = vweird.f32 %v655_v10 }
  0xe4   : > { %v308_v13 = vpop.xlane.xlu0 %307  ;;  %v310_v15 = vmul.f32 %v657_v11, %v306_v8  ;;  %vm368_vm2 = vmor %vm366_vm0, %vm367_vm1  ;;  %vm316_vm4 = vweird.f32 %v657_v11 }
  0xe5   : > { %658 = vrsqrt.f32 %v308_v13  ;;  %v362_v17 = vmul.f32 %v655_v10, %v361_v12  ;;  %vm317_vm6 = vmor %vm315_vm5, %vm316_vm4  ;;  %vm325_vm8 = vweird.f32 %v308_v13 }
  0xe6   : > { %v311_v18 = vmul.f32 %v657_v11, %v310_v15 }
  0xe7   : > { %v363_v19 = vmul.f32 0.5, %v362_v17 }
  0xe8   : > { %v312_v21 = vmul.f32 0.5, %v311_v18 }
  0xe9   : > { %v364_v22 = vsub.f32 1.5, %v363_v19 }
  0xea   : > { %v313_v24 = vsub.f32 1.5, %v312_v21 }
  0xeb   : > { %v659_v23 = vpop.eup %658  ;;  %v365_v25 = vmul.f32 %v655_v10, %v364_v22 }
  0xec   : > { %v320_v26 = vmul.f32 %v659_v23, %v308_v13  ;;  %v314_v30 = vmul.f32 %v657_v11, %v313_v24  ;;  %vm326_vm7 = vweird.f32 %v659_v23 }
  0xed   : > { %v369_v29 = vsel %vm368_vm2, %v655_v10, %v365_v25  ;;  %vm327_vm9 = vmor %vm325_vm8, %vm326_vm7 }
  0xee   : > { %v321_v31 = vmul.f32 %v659_v23, %v320_v26  ;;  %v374_v32 = vmul.f32 %v369_v29, %v356_v1  ;;  %v318_v38 = vsel %vm317_vm6, %v657_v11, %v314_v30 }
  0xef   : > { %v338_v42 = vmul.f32 %v318_v38, %v301_v2 }
  0xf0   : > { %v322_v33 = vmul.f32 0.5, %v321_v31  ;;  %v377_v34 = vsel %vm373_vm3, %v374_v32, 0.0 }
  0xf1   : > { %v378_v37 = vrot.slane %v377_v34, 4  ;;  %v344_v47 = vsel %vm336_vm10, %v338_v42, 0.0 }
  0xf2   : > { %v323_v39 = vsub.f32 1.5, %v322_v33 }
  0xf3   : > { %v379_v40 = vadd.f32 %v378_v37, %v377_v34 }
  0xf4   : > { %v324_v41 = vmul.f32 %v659_v23, %v323_v39 }
  0xf5   : > { %v380_v43 = vrot.slane %v379_v40, 2 }
  0xf6   : > { %v328_v44 = vsel %vm327_vm9, %v659_v23, %v324_v41 }
  0xf7   : > { %v339_v45 = vmul.f32 %v328_v44, %v302_v5  ;;  %v381_v46 = vadd.f32 %v380_v43, %v379_v40 }
  0xf9   : > { %v345_v48 = vsel %vm337_vm11, %v339_v45, 0.0  ;;  %v382_v49 = vrot.slane %v381_v46, 1 }
  0xfa   : > { %v346_v50 = vadd.f32 %v345_v48, %v344_v47 }
  0xfb   : > { %v383_v52 = vadd.f32 %v382_v49, %v381_v46 }
  0xfc   : > { %v347_v53 = vrot.slane %v346_v50, 4 }
  0xfd   : > { %v384_v54 = vadd.f32 %v383_v52, %v355_v51 }
  0xfe   : > { %v348_v55 = vadd.f32 %v347_v53, %v346_v50 }
  0xff   : > { %385 = vst [vmem:[%s1058_s23] sm:$0x1] %v384_v54 }
 0x100   : > { %v349_v56 = vrot.slane %v348_v55, 2 }
 0x102   : > { %v350_v57 = vadd.f32 %v349_v56, %v348_v55 }
 0x104   : > { %v351_v58 = vrot.slane %v350_v57, 1 }
 0x106   : > { %v352_v60 = vadd.f32 %v351_v58, %v350_v57 }
 0x108   : > { %v353_v61 = vadd.f32 %v352_v60, %v300_v59 }
 0x10a   : > { %354 = vst [vmem:[%s1054_s9] sm:$0x1] %v353_v61 }
 0x10b PF: > { %s399_s29 = scalar_lea.hbm %s1133_s2, %s861_s18  ;;  %s401_s11 = sshll.u32 %s1054_s9, 4  ;;  %s402_s11 = int_to_ptr.vmem [resolvable:$true] %s401_s11 }
 0x10c   : > { %s403_s19 = sshll.u32 %s399_s29, 4  ;;  %s387_s10 = scalar_lea.sflag [#allocation4], %s1050_s5  ;;  %s404_s19 = int_to_ptr.hbm [resolvable:$true] %s403_s19 }
 0x10d   : > { %s741_s22 = sshra.s32 %s404_s19, 4  ;;  %s747_s15 = scalar_lea.hbm %s1133_s2, 2  ;;  %s742_s22 = int_to_ptr.hbm [resolvable:$true] %s741_s22 }
 0x10e   : > { %s743_s30 = scalar_lea.hbm %s742_s22, 1  ;;  %p748_p0 = scmp.lt.s32.totalorder %s742_s22, %s1133_s2 }
 0x10f   : > { %p744_p8 = scmp.ne.s32.totalorder %s742_s22, %s743_s30  ;;  %p749_p4 = scmp.lt.s32.totalorder %s747_s15, %s743_s30 }
 0x111   : > { %p745_p12 = pnand %p744_p8, %p976_p1  ;;  %p750_p7 = por %p749_p4, %p748_p0 }
 0x113   : > { %p746_p13 = pneg %p745_p12 }
 0x115   : > { %p751_p9 = pnand %p750_p7, %p746_p13 }
 0x117   : > { %754 = shalt.err (!%p751_p9)
}
 0x118   : > { %567 = dma.vmem_to_hbm [thread:$0]  (%p976_p1), %s402_s11, 16, %s404_s19, %s387_s10  }
 0x119   : > { %s412_s9 = scalar_lea.hbm %s1134_s3, %s861_s18  ;;  %s414_s28 = sshll.u32 %s1058_s23, 4  ;;  %s415_s28 = int_to_ptr.vmem [resolvable:$true] %s414_s28 }
 0x11a   : > { %s416_s24 = sshll.u32 %s412_s9, 4  ;;  %s391_s4 = scalar_lea.sflag [#allocation9], %s1050_s5  ;;  %s417_s24 = int_to_ptr.hbm [resolvable:$true] %s416_s24 }
 0x11b   : > { %s769_s21 = sshra.s32 %s417_s24, 4  ;;  %s775_s11 = scalar_lea.hbm %s1134_s3, 2  ;;  %s770_s21 = int_to_ptr.hbm [resolvable:$true] %s769_s21 }
 0x11c   : > { %s771_s29 = scalar_lea.hbm %s770_s21, 1  ;;  %p776_p6 = scmp.lt.s32.totalorder %s770_s21, %s1134_s3 }
 0x11d   : > { %p772_p5 = scmp.ne.s32.totalorder %s770_s21, %s771_s29  ;;  %p777_p8 = scmp.lt.s32.totalorder %s775_s11, %s771_s29 }
 0x11f   : > { %p773_p10 = pnand %p772_p5, %p976_p1  ;;  %p778_p12 = por %p777_p8, %p776_p6 }
 0x121   : > { %p774_p11 = pneg %p773_p10 }
 0x123   : > { %p779_p13 = pnand %p778_p12, %p774_p11 }
 0x125   : > { %782 = shalt.err (!%p779_p13)
}
 0x126   : > { %568 = dma.vmem_to_hbm [thread:$0]  (%p976_p1), %s415_s28, 16, %s417_s24, %s391_s4  }
 0x127 PF: > { %s428_s18 = sand.u32 1, %s837_s12   ;;  %p572_p0 = pnand %p544_p3, %p980_p2 }
 0x128   : > { %s429_s5 = scalar_lea.sflag [#allocation4], %s428_s18 }
 0x129   : > { %p573_p4 = pneg %p572_p0 }
 0x12b   : > { %828 = dma.done.wait (%p573_p4), %s429_s5, 16  }
 0x12c   : > { %830 = vsyncadd (%p573_p4), %s429_s5, 4294967280  ;;  %s438_s23 = scalar_lea.sflag [#allocation9], %s428_s18 }
 0x12d   : > { %832 = dma.done.wait (%p573_p4), %s438_s23, 16  }
 0x12e   : > { %834 = vsyncadd (%p573_p4), %s438_s23, 4294967280  ;;  %s26_s20 = sadd.s32 1, %s869_s20   ;;  %s1152_s7 = sld [smem:[#allocation14_spill]] }
 0x12f   : > { %p23_p7 = scmp.ge.s32.totalorder %s26_s20, 4   ;;  %s1153_s14 = sld [smem:[#allocation17_spill]] }
 0x130   : > { %s1154_s25 = sld [smem:[#allocation18_spill]]  ;;  %s1157_s12 = smov %s841_s13 }
 0x131   : > { %s1155_s18 = sld [smem:[#allocation15_spill]]  ;;  %s1159_s15 = smov %s853_s16 }
 0x132   : > { %s1156_s19 = sld [smem:[#allocation16_spill]]  ;;  %s1160_s16 = smov %s857_s17 }
 0x133   :  { %25 = sbr.rel (!%p23_p7) target bundleno = 14 (0xe), region = 111 }
 0x134   : > { %s1158_s13 = smov %s1152_s7 }
 0x136   : > { %s1161_s17 = smov %s1154_s25 }
 0x138   :  { %443 = vsyncpa [#allocation3], 1 }
 0x139   :  { %445 = vsyncpa [#allocation3 + $0x1], 1 }
 0x13a   :  { %446 = vsyncpa [#allocation6], 1 }
 0x13b   :  { %448 = vsyncpa [#allocation6 + $0x1], 1 }
 0x13c   :  { %449 = vsyncpa [#allocation4], 1 }
 0x13d   :  { %451 = vsyncpa [#allocation4 + $0x1], 1 }
 0x13e   :  { %452 = vsyncpa [#allocation9], 1 }
 0x13f   :  { %454 = vsyncpa [#allocation9 + $0x1], 1 }

</bundles_post_ra>
